<compile_context>
chip_gen: v5e
topology: v5e:2x2
jax: 0.10.0
libtpu: 0.0.40
codegen_flags: <defaults>
</compile_context>

<pallas_src>
import numpy as np
import jax
import jax.numpy as jnp
from jax.experimental import pallas as pl
from jax.experimental.pallas import tpu as pltpu

NUM_TAGS = 19          # self.num_tags
START_LBL = 17         # lbl_to_id['START_LBL']
PAD_LBL = 0            # lbl_to_id['PAD_LBL']
STR_LBL = 18           # lbl_to_id['STR_LBL'] = 18
NEG_INIT = -1000.0
LANE = 128


def _round_up(x, m):
    return (x + m - 1) // m * m


# ----------------------------------------------------------------------------
# Kernel 1: emission projection  (Linear -> ReLU -> Linear), lane-dense output
# ----------------------------------------------------------------------------
def proj_kernel(h_ref, w1_ref, b1_ref, w2_ref, b2_ref, out_ref):
    h = h_ref[...]                                                   # (tile, 2*in)
    z = jnp.dot(h, w1_ref[...], preferred_element_type=jnp.float32) + b1_ref[...]
    z = jnp.maximum(z, 0.0)                                          # ReLU
    out_ref[...] = (jnp.dot(z, w2_ref[...], preferred_element_type=jnp.float32)
                    + b2_ref[...]).astype(out_ref.dtype)             # (tile, 128)


def proj_emissions(h_flat, w1, b1, w2, b2, *, max_row_tile=256):
    n, d_in = h_flat.shape
    d_hid = w1.shape[1]
    n_tags = w2.shape[1]

    # Large row tiles to amortize per-grid-step overhead; pad rows to a full tile.
    row_tile = min(max_row_tile, _round_up(n, 8))
    n_pad = _round_up(n, row_tile)
    lane_out = _round_up(n_tags, LANE)                               # 19 -> 128 lane-dense slab

    h_p = jnp.pad(h_flat, ((0, n_pad - n), (0, 0)))
    w2_p = jnp.pad(w2, ((0, 0), (0, lane_out - n_tags)))
    b2_p = jnp.pad(b2, ((0, 0), (0, lane_out - n_tags)))

    out = pl.pallas_call(
        proj_kernel,
        out_shape=jax.ShapeDtypeStruct((n_pad, lane_out), jnp.float32),
        grid_spec=pltpu.PrefetchScalarGridSpec(
            num_scalar_prefetch=0,
            grid=(n_pad // row_tile,),
            in_specs=[
                pl.BlockSpec((row_tile, d_in), lambda i: (i, 0)),
                pl.BlockSpec((d_in, d_hid), lambda i: (0, 0)),
                pl.BlockSpec((1, d_hid), lambda i: (0, 0)),
                pl.BlockSpec((d_hid, lane_out), lambda i: (0, 0)),
                pl.BlockSpec((1, lane_out), lambda i: (0, 0)),
            ],
            out_specs=pl.BlockSpec((row_tile, lane_out), lambda i: (i, 0)),
        ),
        compiler_params=pltpu.CompilerParams(dimension_semantics=("parallel",)),
    )(h_p, w1, b1, w2_p, b2_p)
    return out[:n, :n_tags]


# ----------------------------------------------------------------------------
# Kernel 2: CRF Viterbi forward DP (the hot loop of predict())
#   grid = (batch_chunks [parallel], time_chunks [arbitrary])
#   the per-timestep loop runs inside the kernel; DP state lives in VMEM scratch.
# ----------------------------------------------------------------------------
def viterbi_kernel(p_ref, mask_ref, t_ref, dp_out_ref, choice_ref, dp_scratch):
    tc = pl.program_id(1)
    Bt = dp_scratch.shape[0]
    Tt = p_ref.shape[1]

    @pl.when(tc == 0)
    def _():
        tag_ids = jax.lax.broadcasted_iota(jnp.int32, (Bt, NUM_TAGS), 1)
        dp_scratch[...] = jnp.where(tag_ids == START_LBL, 0.0, NEG_INIT).astype(jnp.float32)

    T = t_ref[...]                           # (19, 19)  T[next, prev]
    T_b = T[None, :, :]                      # hoisted broadcast, reused every timestep
    t_pad_row = T[PAD_LBL][None, :]          # (1, 19)

    def step(i, dp):
        scores = dp[:, None, :] + T_b                              # (Bt, next, prev)
        best = jnp.max(scores, axis=-1)                            # (Bt, 19)
        arg = jnp.argmax(scores, axis=-1).astype(jnp.int32)        # (Bt, 19)
        choice_ref[:, pl.ds(i, 1), :] = arg[:, None, :]            # torch layout (B, L, 19)
        emission = p_ref[:, pl.ds(i, 1), :][:, 0, :]               # (Bt, 19)
        sm = mask_ref[:, pl.ds(i, 1), :][:, 0, :]                  # (Bt, 1)
        return (best + emission) * sm + dp * (1.0 - sm)

    dp = jax.lax.fori_loop(0, Tt, step, dp_scratch[...])
    dp_scratch[...] = dp

    @pl.when(tc == pl.num_programs(1) - 1)
    def _():
        dp_out_ref[...] = dp + t_pad_row                           # DP += T[PAD_LBL]


def crf_viterbi(emissions, mask, T, *, time_tile=128, batch_tile=128):
    """emissions: (B, L, 19) f32 (torch layout), mask: (B, L), T: (19, 19).
    Returns (DP (B, 19) f32, choice (B, L, 19) int32 backpointers)."""
    B, L, _ = emissions.shape

    # Pad batch to a multiple of 8 (sublane) and of the batch tile; pad time to the chunk.
    B_pad = _round_up(B, 8)
    Bt = min(batch_tile, B_pad)
    B_pad = _round_up(B_pad, Bt)
    Tt = min(time_tile, _round_up(L, 8))
    L_pad = _round_up(L, Tt)

    P = jnp.pad(emissions, ((0, B_pad - B), (0, L_pad - L), (0, 0)))
    M = jnp.pad(mask.astype(jnp.float32), ((0, B_pad - B), (0, L_pad - L)))[:, :, None]

    dp_final, choice = pl.pallas_call(
        viterbi_kernel,
        out_shape=(jax.ShapeDtypeStruct((B_pad, NUM_TAGS), jnp.float32),
                   jax.ShapeDtypeStruct((B_pad, L_pad, NUM_TAGS), jnp.int32)),
        grid_spec=pltpu.PrefetchScalarGridSpec(
            num_scalar_prefetch=0,
            grid=(B_pad // Bt, L_pad // Tt),
            in_specs=[
                pl.BlockSpec((Bt, Tt, NUM_TAGS), lambda b, t: (b, t, 0)),   # emissions
                pl.BlockSpec((Bt, Tt, 1), lambda b, t: (b, t, 0)),          # mask
                pl.BlockSpec((NUM_TAGS, NUM_TAGS), lambda b, t: (0, 0)),    # T (resident)
            ],
            out_specs=[
                pl.BlockSpec((Bt, NUM_TAGS), lambda b, t: (b, 0)),          # DP accumulator
                pl.BlockSpec((Bt, Tt, NUM_TAGS), lambda b, t: (b, t, 0)),   # backpointers
            ],
            scratch_shapes=[pltpu.VMEM((Bt, NUM_TAGS), jnp.float32)],
        ),
        compiler_params=pltpu.CompilerParams(
            dimension_semantics=("parallel", "arbitrary")),
    )(P, M, T)
    return dp_final[:B], choice[:B, :L]


# ----------------------------------------------------------------------------
# Pure-JAX references (for validation)
# ----------------------------------------------------------------------------
def proj_ref(h_flat, w1, b1, w2, b2):
    return jnp.maximum(h_flat @ w1 + b1, 0.0) @ w2 + b2


def viterbi_ref(P, mask, T):
    B, L, _ = P.shape
    dp = jnp.full((B, NUM_TAGS), NEG_INIT, jnp.float32).at[:, START_LBL].set(0.0)
    choices = []
    for t in range(L):
        scores = dp[:, None, :] + T[None, :, :]
        best, arg = scores.max(-1), scores.argmax(-1)
        choices.append(arg.astype(jnp.int32))
        sm = mask[:, t].astype(jnp.float32)[:, None]
        dp = (best + P[:, t]) * sm + dp * (1.0 - sm)
    return dp + T[PAD_LBL][None, :], jnp.stack(choices, axis=1)


# ----------------------------------------------------------------------------
# Host-side glue: full predict() including the per-example Python backtrack
# ----------------------------------------------------------------------------
def backtrack(dp_final, choice, mask):
    dp_final = np.asarray(dp_final)
    choice = np.asarray(choice)
    mask = np.asarray(mask)
    paths = []
    last_elem = dp_final.argmax(-1)
    for i in range(dp_final.shape[0]):
        n = int(mask[i].sum())
        path = [int(last_elem[i])]
        prev = int(last_elem[i])
        for j in range(n - 2, -1, -1):
            prev = int(choice[i][j + 1][prev])
            path.append(prev)
        path.reverse()
        paths.append(path)
    return paths


if __name__ == "__main__":
    # Small shapes: batch=4, seq=8, input_size=32 -> BiLSTM features of width 2*32=64.
    B, L, INPUT_SIZE = 4, 8, 32
    D_IN = 2 * INPUT_SIZE

    key = jax.random.PRNGKey(0)
    k_h, k_T, k_w1, k_b1, k_w2, k_b2 = jax.random.split(key, 6)

    # Synthetic stand-in for lstm_model(W, X) output (see TODO above).
    H = jax.random.normal(k_h, (B, L, D_IN), dtype=jnp.float32)
    mask = jnp.ones((B, L), dtype=jnp.int32)

    # Deterministic parameters (shapes from __init__).
    T = jax.random.normal(k_T, (NUM_TAGS, NUM_TAGS), dtype=jnp.float32)      # self.T
    w1 = jax.random.normal(k_w1, (D_IN, INPUT_SIZE), dtype=jnp.float32) * 0.1
    b1 = jax.random.normal(k_b1, (1, INPUT_SIZE), dtype=jnp.float32) * 0.1
    w2 = jax.random.normal(k_w2, (INPUT_SIZE, NUM_TAGS), dtype=jnp.float32) * 0.1
    b2 = jax.random.normal(k_b2, (1, NUM_TAGS), dtype=jnp.float32) * 0.1
    # nn.Dropout(0.5) is identity at inference time.

    # --- emission projection (self.proj) in Pallas ---
    h_flat = H.reshape(B * L, D_IN)
    P = proj_emissions(h_flat, w1, b1, w2, b2).reshape(B, L, NUM_TAGS)
    P = jax.block_until_ready(P)

    # --- CRF Viterbi DP (predict() hot path) in Pallas ---
    dp_final, choice = crf_viterbi(P, mask, T)
    dp_final = jax.block_until_ready(dp_final)
    choice = jax.block_until_ready(choice)

    # Validate against pure-JAX references.
    P_ref = proj_ref(h_flat, w1, b1, w2, b2).reshape(B, L, NUM_TAGS)
    dp_ref, choice_ref_ = viterbi_ref(P_ref, mask, T)
    np.testing.assert_allclose(np.asarray(P), np.asarray(P_ref), rtol=1e-5, atol=1e-5)
    np.testing.assert_allclose(np.asarray(dp_final), np.asarray(dp_ref), rtol=1e-5, atol=1e-4)
    np.testing.assert_array_equal(np.asarray(choice), np.asarray(choice_ref_))

    _ = backtrack(dp_final, choice, mask)   # host-side glue, same as torch's CPU loop

    print("KERNEL_OK")
</pallas_src>

<mosaic_0001>
module attributes {stable_mosaic.version = 11 : i64} {
  func.func @proj_kernel(%arg0: i32, %arg1: memref<32x64xf32, #tpu.memory_space<vmem>>, %arg2: memref<64x32xf32, #tpu.memory_space<vmem>>, %arg3: memref<1x32xf32, #tpu.memory_space<vmem>>, %arg4: memref<32x128xf32, #tpu.memory_space<vmem>>, %arg5: memref<1x128xf32, #tpu.memory_space<vmem>>, %arg6: memref<32x128xf32, #tpu.memory_space<vmem>>) attributes {dimension_semantics = [#tpu.dimension_semantics<parallel>], iteration_bounds = array<i64: 1>, scalar_prefetch = 0 : i64, scratch_operands = 0 : i64, tpu.core_type = #tpu.core_type<tc>, window_params = [{transform_indices = @transform_0, window_bounds = array<i64: 32, 64>}, {pipeline_mode = #tpu.pipeline_mode<synchronous>, transform_indices = @transform_1, window_bounds = array<i64: 64, 32>}, {pipeline_mode = #tpu.pipeline_mode<synchronous>, transform_indices = @transform_2, window_bounds = array<i64: 1, 32>}, {pipeline_mode = #tpu.pipeline_mode<synchronous>, transform_indices = @transform_3, window_bounds = array<i64: 32, 128>}, {pipeline_mode = #tpu.pipeline_mode<synchronous>, transform_indices = @transform_4, window_bounds = array<i64: 1, 128>}, {transform_indices = @transform_5, window_bounds = array<i64: 32, 128>}]} {
    %c0 = arith.constant 0 : index
    %c0_0 = arith.constant 0 : index
    %0 = vector.load %arg1[%c0, %c0_0] : memref<32x64xf32, #tpu.memory_space<vmem>>, vector<32x64xf32>
    %c0_1 = arith.constant 0 : index
    %c0_2 = arith.constant 0 : index
    %1 = vector.load %arg2[%c0_1, %c0_2] : memref<64x32xf32, #tpu.memory_space<vmem>>, vector<64x32xf32>
    %cst = arith.constant dense<0.000000e+00> : vector<32x32xf32>
    %2 = tpu.matmul %0, %1, %cst {dimension_numbers = #tpu.dot_dimension_numbers<[1], [0], [0], [1], [0, 0, 1, 1], [], []>} : vector<32x64xf32>, vector<64x32xf32>, vector<32x32xf32> -> vector<32x32xf32>
    %c0_3 = arith.constant 0 : index
    %c0_4 = arith.constant 0 : index
    %3 = vector.load %arg3[%c0_3, %c0_4] : memref<1x32xf32, #tpu.memory_space<vmem>>, vector<1x32xf32>
    %4 = vector.broadcast %3 : vector<1x32xf32> to vector<32x32xf32>
    %5 = arith.addf %2, %4 : vector<32x32xf32>
    %cst_5 = arith.constant 0.000000e+00 : f32
    %6 = vector.broadcast %cst_5 : f32 to vector<32x32xf32>
    %7 = arith.maximumf %5, %6 : vector<32x32xf32>
    %c0_6 = arith.constant 0 : index
    %c0_7 = arith.constant 0 : index
    %8 = vector.load %arg4[%c0_6, %c0_7] : memref<32x128xf32, #tpu.memory_space<vmem>>, vector<32x128xf32>
    %cst_8 = arith.constant dense<0.000000e+00> : vector<32x128xf32>
    %9 = tpu.matmul %7, %8, %cst_8 {dimension_numbers = #tpu.dot_dimension_numbers<[1], [0], [0], [1], [0, 0, 1, 1], [], []>} : vector<32x32xf32>, vector<32x128xf32>, vector<32x128xf32> -> vector<32x128xf32>
    %c0_9 = arith.constant 0 : index
    %c0_10 = arith.constant 0 : index
    %10 = vector.load %arg5[%c0_9, %c0_10] : memref<1x128xf32, #tpu.memory_space<vmem>>, vector<1x128xf32>
    %11 = vector.broadcast %10 : vector<1x128xf32> to vector<32x128xf32>
    %12 = arith.addf %9, %11 : vector<32x128xf32>
    %c0_11 = arith.constant 0 : index
    %c0_12 = arith.constant 0 : index
    %13 = vector.load %arg6[%c0_11, %c0_12] : memref<32x128xf32, #tpu.memory_space<vmem>>, vector<32x128xf32>
    tpu.vector_store %arg6[%c0_11, %c0_12], %12 {strides = array<i32>} : memref<32x128xf32, #tpu.memory_space<vmem>>, vector<32x128xf32>,
    return
  }
  func.func @transform_0(%arg0: i32) -> (i32, i32) {
    %c0_i32 = arith.constant 0 : i32
    %c0_i32_0 = arith.constant 0 : i32
    return %arg0, %c0_i32 : i32, i32
  }
  func.func @transform_1(%arg0: i32) -> (i32, i32) {
    %c0_i32 = arith.constant 0 : i32
    %c0_i32_0 = arith.constant 0 : i32
    %c0_i32_1 = arith.constant 0 : i32
    return %c0_i32, %c0_i32_0 : i32, i32
  }
  func.func @transform_2(%arg0: i32) -> (i32, i32) {
    %c0_i32 = arith.constant 0 : i32
    %c0_i32_0 = arith.constant 0 : i32
    %c0_i32_1 = arith.constant 0 : i32
    return %c0_i32, %c0_i32_0 : i32, i32
  }
  func.func @transform_3(%arg0: i32) -> (i32, i32) {
    %c0_i32 = arith.constant 0 : i32
    %c0_i32_0 = arith.constant 0 : i32
    %c0_i32_1 = arith.constant 0 : i32
    return %c0_i32, %c0_i32_0 : i32, i32
  }
  func.func @transform_4(%arg0: i32) -> (i32, i32) {
    %c0_i32 = arith.constant 0 : i32
    %c0_i32_0 = arith.constant 0 : i32
    %c0_i32_1 = arith.constant 0 : i32
    return %c0_i32, %c0_i32_0 : i32, i32
  }
  func.func @transform_5(%arg0: i32) -> (i32, i32) {
    %c0_i32 = arith.constant 0 : i32
    %c0_i32_0 = arith.constant 0 : i32
    return %arg0, %c0_i32 : i32, i32
  }
}

</mosaic_0001>

<bundles_post_ra>
// kernel: tpu_custom_call.1
= control target key start
LH: loop header
LB: loop body
LE: loop exit
PB: predicated region body
PF: predicated region fallthrough
CT: control target
= control target key end

     0   :  { %s296_s0 = inlined_call_operand.vmem [shape: f32[32,64], index: 0, kind: input, shape index: {}]   ;;  %s297_s1 = inlined_call_operand.vmem [shape: f32[64,32], index: 1, kind: input, shape index: {}]   ;;  %s298_s2 = inlined_call_operand.vmem [shape: f32[1,32], index: 2, kind: input, shape index: {}]   ;;  %s299_s3 = inlined_call_operand.vmem [shape: f32[32,128], index: 3, kind: input, shape index: {}]   ;;  %s300_s4 = inlined_call_operand.vmem [shape: f32[1,128], index: 4, kind: input, shape index: {}]   ;;  %s301_s5 = inlined_call_operand.hbm [shape: f32[32,128], index: 5, kind: output, shape index: {}]  }
   0x1   :  { %v32_v0 = vld [vmem:[%s297_s1 + $0x38] sm:$0xff]  ;;  %v31_v1 = vld [vmem:[%s297_s1 + $0x30] sm:$0xff]  ;;  %v30_v2 = vld [vmem:[%s297_s1 + $0x28] sm:$0xff] }
   0x2   :  { %58 = vmatpush.msra.mxu0 %v32_v0  ;;  %163 = vmatpush.msra.mxu2 %v32_v0  ;;  %v29_v3 = vld [vmem:[%s297_s1 + $0x20] sm:$0xff]  ;;  %v86_v4 = vld [vmem:[%s299_s3 + $0x18] sm:$0xff] }
   0x4   :  { %59 = vmatpush.msra.mxu0 %v31_v1  ;;  %164 = vmatpush.msra.mxu2 %v31_v1 }
   0x6   :  { %60 = vmatpush.msra.mxu0 %v30_v2  ;;  %165 = vmatpush.msra.mxu2 %v30_v2 }
   0x7   :  { %10 = vsyncpa [#allocation3], 0  ;;  %v28_v5 = vld [vmem:[%s297_s1 + $0x18] sm:$0xff]  ;;  %116 = vmatpush.msra.mxu1 %v86_v4  ;;  %171 = vmatpush.msra.mxu3 %v86_v4  ;;  %v27_v6 = vld [vmem:[%s297_s1 + $0x10] sm:$0xff]  ;;  %vm37_vm0 = vcmask 523264   ;;  %vm91_vm1 = vcmask 261120  }
   0x8   :  { %61 = vmatpush.msra.mxu0 %v29_v3  ;;  %166 = vmatpush.msra.mxu2 %v29_v3  ;;  %v26_v7 = vld [vmem:[%s297_s1 + $0x8] sm:$0xff]  ;;  %v25_v8 = vld [vmem:[%s297_s1] sm:$0xff]  ;;  %v23_v10 = vld [vmem:[%s296_s0 + $0x10] sm:$0xff]  ;;  %s143_s29 = sshll.u32 %s301_s5, 4  ;;  %s208_s30 = smov 8   ;;  %s144_s29 = int_to_ptr.hbm [resolvable:$true] %s143_s29 }
   0x9   :  { %v21_v9 = vld [vmem:[%s296_s0] sm:$0xff]  ;;  %v22_v11 = vld [vmem:[%s296_s0 + $0x8] sm:$0xff]  ;;  %v24_v12 = vld [vmem:[%s296_s0 + $0x18] sm:$0xff] }
   0xa   :  { %62 = vmatpush.msra.mxu0 %v28_v5  ;;  %167 = vmatpush.msra.mxu2 %v28_v5  ;;  %v85_v13 = vld [vmem:[%s299_s3 + $0x10] sm:$0xff]  ;;  %v84_v14 = vld [vmem:[%s299_s3 + $0x8] sm:$0xff]  ;;  %v83_v15 = vld [vmem:[%s299_s3] sm:$0xff] }
   0xb   :  { %117 = vmatpush.msra.mxu1 %v85_v13  ;;  %172 = vmatpush.msra.mxu3 %v85_v13  ;;  %v178_v16 = vld [vmem:[%s298_s2] ss:$0 sm:$0xff]  ;;  %s206_s2 = smov [#allocation2]  }
   0xc   :  { %63 = vmatpush.msra.mxu0 %v27_v6  ;;  %168 = vmatpush.msra.mxu2 %v27_v6  ;;  %v179_v29 = vld [vmem:[%s300_s4] ss:$0 sm:$0xff]  ;;  %s141_s26 = sshll.u32 %s206_s2, 4  ;;  %s207_s4 = smov 128   ;;  %s142_s26 = int_to_ptr.vmem [resolvable:$true] %s141_s26 }
   0xd   :  { %118 = vmatpush.msra.mxu1 %v84_v14  ;;  %173 = vmatpush.msra.mxu3 %v84_v14 }
   0xe   :  { %64 = vmatpush.msra.mxu0 %v26_v7  ;;  %169 = vmatpush.msra.mxu2 %v26_v7 }
   0xf   :  { %119 = vmatpush.msra.mxu1 %v83_v15  ;;  %174 = vmatpush.msra.mxu3 %v83_v15 }
  0x10   :  { %65 = vmatpush.msra.mxu0 %v25_v8  ;;  %170 = vmatpush.msra.mxu2 %v25_v8 }
  0x11   :  { %155 = vmatmul.msk.f32.vlgmr.msra.gmra.mxu0 %vm37_vm0, %v21_v9  ;;  %157 = vmatmul.msk.f32.vlgmr.msra.gmra.mxu2 %vm37_vm0, %v23_v10 }
  0x19   :  { %156 = vmatmul.msk.f32.gmra.mxu0 %vm37_vm0, %v22_v11  ;;  %158 = vmatmul.msk.f32.gmra.mxu2 %vm37_vm0, %v24_v12 }
  0x8e   :  { %v67_v17 = vpop.f32.mrf.mxu0 }
  0x8f   :  { %v68_v18 = vadd.f32 %v178_v16, %v67_v17 }
  0x91   :  { %v79_v19 = vmax.f32 %v68_v18, 0.0 }
  0x93   :  { %159 = vmatmul.msk.f32.vlgmr.msra.gmra.mxu1 %vm91_vm1, %v79_v19 }
  0x94   :  { %v73_v21 = vpop.f32.mrf.mxu2 }
  0x95   :  { %v74_v24 = vadd.f32 %v178_v16, %v73_v21 }
  0x96   :  { %v70_v20 = vpop.f32.mrf.mxu0 }
  0x97   :  { %v71_v22 = vadd.f32 %v178_v16, %v70_v20  ;;  %v81_v25 = vmax.f32 %v74_v24, 0.0 }
  0x99   :  { %v80_v23 = vmax.f32 %v71_v22, 0.0 }
  0x9b   :  { %160 = vmatmul.msk.f32.vlgmr.msra.gmra.mxu3 %vm91_vm1, %v80_v23 }
  0x9c   :  { %v76_v26 = vpop.f32.mrf.mxu2 }
  0x9d   :  { %v77_v27 = vadd.f32 %v178_v16, %v76_v26 }
  0x9f   :  { %v82_v28 = vmax.f32 %v77_v27, 0.0 }
  0xa3   :  { %161 = vmatmul.msk.f32.gmra.mxu3 %vm91_vm1, %v81_v25 }
  0xab   :  { %162 = vmatmul.msk.f32.gmra.mxu3 %vm91_vm1, %v82_v28 }
 0x110   :  { %v121_v30 = vpop.f32.mrf.mxu1 }
 0x111   :  { %v122_v31 = vadd.f32 %v179_v29, %v121_v30 }
 0x113   :  { %133 = vst [vmem:[#allocation2] sm:$0xff] %v122_v31 }
 0x11e   :  { %v124_v32 = vpop.f32.mrf.mxu3 }
 0x11f   :  { %v125_v33 = vadd.f32 %v179_v29, %v124_v32 }
 0x121   :  { %134 = vst [vmem:[#allocation2 + $0x8] sm:$0xff] %v125_v33 }
 0x126   :  { %v127_v34 = vpop.f32.mrf.mxu3 }
 0x127   :  { %v128_v35 = vadd.f32 %v179_v29, %v127_v34 }
 0x129   :  { %135 = vst [vmem:[#allocation2 + $0x10] sm:$0xff] %v128_v35 }
 0x12e   :  { %v130_v36 = vpop.f32.mrf.mxu3 }
 0x12f   :  { %v131_v37 = vadd.f32 %v179_v29, %v130_v36 }
 0x131   :  { %136 = vst [vmem:[#allocation2 + $0x18] sm:$0xff] %v131_v37 }
 0x132   :  { %149 = dma.vmem_to_hbm [thread:$0]  %s142_s26, 512, %s144_s29, [#allocation3], %s207_s4, %s207_s4, %s208_s30  }
 0x133   :  { %204 = dma.done.wait [#allocation3], 512  }
 0x134   :  { %205 = vsyncadd [#allocation3], 4294966784 }
 0x135   :  { %154 = vsyncpa [#allocation3], 1 }

</bundles_post_ra>
